<compile_context>
chip_gen: v6e
topology: v6e:2x2x1
jax: 0.10.0
libtpu: 0.0.40
codegen_flags: <defaults>
</compile_context>

<pallas_src>
import functools

import jax
import jax.numpy as jnp
from jax.experimental import pallas as pl
from jax.experimental.pallas import tpu as pltpu


def _cdiv(a, b):
    return -(-a // b)


def _round_up(x, m):
    return ((x + m - 1) // m) * m


# ---------------------------------------------------------------------------
# Pass 1: edge_states = MLP(edge_input)   (tanh after every Linear, incl. out)
# ---------------------------------------------------------------------------
def _edge_mlp_kernel(num_layers, *refs):
    # refs = (x_ref, W0, b0, ..., W_{L-1}, b_{L-1}, out_ref)
    x_ref = refs[0]
    out_ref = refs[1 + 2 * num_layers]

    h = x_ref[...]                                     # bf16 (te, d_i_pad)
    for layer in range(num_layers):
        w_ref = refs[1 + 2 * layer]                    # bf16 weights
        b_ref = refs[2 + 2 * layer]                    # f32 bias (1, width)
        z = jnp.dot(h, w_ref[...], preferred_element_type=jnp.float32) + b_ref[...]
        # tanh kept in f32 (portable: v5e has no bf16 EUP); re-cast to bf16 so
        # the next matmul runs native bf16 on the MXU with f32 accumulation.
        h = jnp.tanh(z).astype(jnp.bfloat16)
    out_ref[...] = h


# ---------------------------------------------------------------------------
# Pass 2: new_state = agg_matrix @ edge_states   (k-axis block accumulation)
# ---------------------------------------------------------------------------
def _agg_kernel(agg_ref, es_ref, out_ref, acc_ref):
    k = pl.program_id(1)

    @pl.when(k == 0)
    def _init():
        acc_ref[...] = jnp.zeros_like(acc_ref)

    acc_ref[...] += jnp.dot(
        agg_ref[...], es_ref[...], preferred_element_type=jnp.float32
    )

    @pl.when(k == pl.num_programs(1) - 1)
    def _flush():
        out_ref[...] = acc_ref[...].astype(out_ref.dtype)


def state_transition_pallas(node_states, node_labels, edges, agg_matrix, params):
    """params: list of (W [d_in, d_out], b [1, d_out]) fp32 arrays."""
    # --- glue: gather edge features (pure indexing / concat, no heavy math) ---
    # TODO(synk): fuse this gather into pass 1 via scalar-prefetched edge
    # indices + manual DMA row-gather to drop the edge_input HBM round trip.
    src_label = node_labels[edges[:, 0]]
    tgt_label = node_labels[edges[:, 1]]
    tgt_state = node_states[edges[:, 1]]
    edge_input = jnp.concatenate([src_label, tgt_label, tgt_state], axis=-1)

    E, d_i = edge_input.shape
    N = agg_matrix.shape[0]
    d_o = params[-1][0].shape[1]
    num_layers = len(params)

    d_i_pad = _round_up(d_i, 128)
    d_o_pad = _round_up(d_o, 128)

    # E tiling (shared by both passes): tile <= 2048, multiple of 128, padding
    # only as much as the tile requires.
    grid_e = _cdiv(E, 2048)
    te = _round_up(_cdiv(E, grid_e), 128)
    E_pad = te * grid_e

    # N tiling: tn <= 512 (multiple of 16 for the bf16 agg tile).  Force >= 2
    # row tiles when N is large enough so the "parallel" axis still splits
    # across TensorCores.
    grid_n = _cdiv(N, 512)
    if grid_n == 1 and N > 32:
        grid_n = 2
    tn = _round_up(_cdiv(N, grid_n), 16)
    N_pad = tn * grid_n

    # --- bf16-first padding (no full-size f32 intermediates) ----------------
    edge_input_p = jnp.pad(
        edge_input.astype(jnp.bfloat16), ((0, E_pad - E), (0, d_i_pad - d_i))
    )
    agg_p = jnp.pad(
        agg_matrix.astype(jnp.bfloat16), ((0, N_pad - N), (0, E_pad - E))
    )
    # NOTE: padded agg columns are exactly zero; padded edge rows give
    # h = tanh(bias-only) != 0 but are annihilated by those zero columns.

    # Pad weights only where layout needs it: layer-0 input rows to d_i_pad,
    # last-layer output cols to d_o_pad.  Hidden widths stay at true size.
    flat_params = []
    layer_dims = []
    for li, (w, b) in enumerate(params):
        din, dout = w.shape
        din_p = d_i_pad if li == 0 else din
        dout_p = d_o_pad if li == num_layers - 1 else dout
        w_p = jnp.zeros((din_p, dout_p), jnp.float32).at[:din, :dout].set(w)
        b_p = jnp.zeros((1, dout_p), jnp.float32).at[:, :dout].set(b.reshape(1, -1))
        flat_params += [w_p.astype(jnp.bfloat16), b_p]   # bf16 W, f32 bias
        layer_dims.append((din_p, dout_p))

    vmem_limit = 48 * 1024 * 1024

    # ----------------------------- pass 1 -----------------------------------
    mlp_in_specs = [pl.BlockSpec((te, d_i_pad), lambda e: (e, 0))]
    for w_p, b_p in zip(flat_params[0::2], flat_params[1::2]):
        # Tiny, grid-invariant operands stay fully VMEM-resident.
        mlp_in_specs.append(pl.BlockSpec(w_p.shape, lambda e: (0, 0)))
        mlp_in_specs.append(pl.BlockSpec(b_p.shape, lambda e: (0, 0)))

    mlp_cost = pl.CostEstimate(
        flops=int(2 * E_pad * sum(di * do for di, do in layer_dims)),
        transcendentals=int(E_pad * sum(do for _, do in layer_dims)),
        bytes_accessed=int(
            edge_input_p.size * 2
            + sum(p.size * p.dtype.itemsize for p in flat_params)
            + E_pad * d_o_pad * 2
        ),
    )

    edge_states = pl.pallas_call(
        functools.partial(_edge_mlp_kernel, num_layers),
        out_shape=jax.ShapeDtypeStruct((E_pad, d_o_pad), jnp.bfloat16),
        grid_spec=pltpu.PrefetchScalarGridSpec(
            num_scalar_prefetch=0,
            grid=(grid_e,),
            in_specs=mlp_in_specs,
            out_specs=pl.BlockSpec((te, d_o_pad), lambda e: (e, 0)),
        ),
        compiler_params=pltpu.CompilerParams(
            dimension_semantics=("parallel",),
            vmem_limit_bytes=vmem_limit,
        ),
        cost_estimate=mlp_cost,
    )(edge_input_p, *flat_params)

    # ----------------------------- pass 2 -----------------------------------
    agg_cost = pl.CostEstimate(
        flops=int(2 * N_pad * E_pad * d_o_pad),
        transcendentals=0,
        bytes_accessed=int(
            agg_p.size * 2 + edge_states.size * 2 * grid_n + N_pad * d_o_pad * 4
        ),
    )

    out_pad = pl.pallas_call(
        _agg_kernel,
        out_shape=jax.ShapeDtypeStruct((N_pad, d_o_pad), jnp.float32),
        grid_spec=pltpu.PrefetchScalarGridSpec(
            num_scalar_prefetch=0,
            grid=(grid_n, grid_e),
            in_specs=[
                # HBM-bound agg stream: deepen pipelining a notch when there
                # are enough k-tiles to benefit.
                pl.BlockSpec(
                    (tn, te),
                    lambda i, k: (i, k),
                    pipeline_mode=pl.Buffered(min(3, grid_e + 1)),
                ),
                pl.BlockSpec((te, d_o_pad), lambda i, k: (k, 0)),
            ],
            out_specs=pl.BlockSpec((tn, d_o_pad), lambda i, k: (i, 0)),
            scratch_shapes=[pltpu.VMEM((tn, d_o_pad), jnp.float32)],
        ),
        compiler_params=pltpu.CompilerParams(
            dimension_semantics=("parallel", "arbitrary"),
            vmem_limit_bytes=vmem_limit,
        ),
        cost_estimate=agg_cost,
    )(agg_p, edge_states)

    return out_pad[:N, :d_o]


def make_mlp_params(key, input_dim, hidden_sizes, out_dim):
    """Deterministic Xavier-normal-style init (matches MLP.init shapes)."""
    sizes = [input_dim] + list(hidden_sizes) + [out_dim]
    params = []
    for i in range(len(sizes) - 1):
        key, wk = jax.random.split(key)
        fan_in, fan_out = sizes[i], sizes[i + 1]
        std = (2.0 / (fan_in + fan_out)) ** 0.5
        w = std * jax.random.normal(wk, (fan_in, fan_out), dtype=jnp.float32)
        b = jnp.zeros((1, fan_out), dtype=jnp.float32)
        params.append((w, b))
    return params


def state_transition_ref(node_states, node_labels, edges, agg_matrix, params):
    """Pure-JAX f32 reference of the PyTorch forward pass."""
    src_label = node_labels[edges[:, 0]]
    tgt_label = node_labels[edges[:, 1]]
    tgt_state = node_states[edges[:, 1]]
    h = jnp.concatenate([src_label, tgt_label, tgt_state], axis=-1)
    for w, b in params:
        h = jnp.tanh(h @ w + b)
    return agg_matrix @ h


if __name__ == "__main__":
    # Small deterministic example.
    node_state_dim = 32
    node_label_dim = 8
    mlp_hidden_dim = [64]
    N = 8      # nodes
    E = 16     # edges

    key = jax.random.PRNGKey(0)
    k1, k2, k3, k4, k5 = jax.random.split(key, 5)

    node_states = jax.random.normal(k1, (N, node_state_dim), dtype=jnp.float32)
    node_labels = jax.random.normal(k2, (N, node_label_dim), dtype=jnp.float32)
    edges = jax.random.randint(k3, (E, 2), 0, N, dtype=jnp.int32)
    agg_matrix = jax.random.uniform(k4, (N, E), dtype=jnp.float32)

    d_i = node_state_dim + 2 * node_label_dim
    params = make_mlp_params(k5, d_i, mlp_hidden_dim, node_state_dim)

    out = state_transition_pallas(node_states, node_labels, edges, agg_matrix, params)
    out = jax.block_until_ready(out)

    ref = state_transition_ref(node_states, node_labels, edges, agg_matrix, params)
    assert out.shape == (N, node_state_dim)
    # agg_matrix, edge_input, weights and the final-matmul activations are bf16
    # (f32 accumulation), so compare against the f32 reference with a
    # bf16-appropriate tolerance.
    assert jnp.allclose(out, ref, atol=5e-2, rtol=5e-2), "mismatch vs reference"

    print("KERNEL_OK")
</pallas_src>

<mosaic_0001>
module attributes {stable_mosaic.version = 11 : i64} {
  func.func @_edge_mlp_kernel(%arg0: i32, %arg1: memref<128x128xbf16, #tpu.memory_space<vmem>>, %arg2: memref<128x64xbf16, #tpu.memory_space<vmem>>, %arg3: memref<1x64xf32, #tpu.memory_space<vmem>>, %arg4: memref<64x128xbf16, #tpu.memory_space<vmem>>, %arg5: memref<1x128xf32, #tpu.memory_space<vmem>>, %arg6: memref<128x128xbf16, #tpu.memory_space<vmem>>) attributes {dimension_semantics = [#tpu.dimension_semantics<parallel>], iteration_bounds = array<i64: 1>, scalar_prefetch = 0 : i64, scratch_operands = 0 : i64, tpu.core_type = #tpu.core_type<tc>, window_params = [{transform_indices = @transform_0, window_bounds = array<i64: 128, 128>}, {pipeline_mode = #tpu.pipeline_mode<synchronous>, transform_indices = @transform_1, window_bounds = array<i64: 128, 64>}, {pipeline_mode = #tpu.pipeline_mode<synchronous>, transform_indices = @transform_2, window_bounds = array<i64: 1, 64>}, {pipeline_mode = #tpu.pipeline_mode<synchronous>, transform_indices = @transform_3, window_bounds = array<i64: 64, 128>}, {pipeline_mode = #tpu.pipeline_mode<synchronous>, transform_indices = @transform_4, window_bounds = array<i64: 1, 128>}, {transform_indices = @transform_5, window_bounds = array<i64: 128, 128>}]} {
    %c0 = arith.constant 0 : index
    %c0_0 = arith.constant 0 : index
    %0 = vector.load %arg1[%c0, %c0_0] : memref<128x128xbf16, #tpu.memory_space<vmem>>, vector<128x128xbf16>
    %c0_1 = arith.constant 0 : index
    %c0_2 = arith.constant 0 : index
    %1 = vector.load %arg2[%c0_1, %c0_2] : memref<128x64xbf16, #tpu.memory_space<vmem>>, vector<128x64xbf16>
    %cst = arith.constant dense<0.000000e+00> : vector<128x64xf32>
    %2 = tpu.matmul %0, %1, %cst {dimension_numbers = #tpu.dot_dimension_numbers<[1], [0], [0], [1], [0, 0, 1, 1], [], []>} : vector<128x128xbf16>, vector<128x64xbf16>, vector<128x64xf32> -> vector<128x64xf32>
    %c0_3 = arith.constant 0 : index
    %c0_4 = arith.constant 0 : index
    %3 = vector.load %arg3[%c0_3, %c0_4] : memref<1x64xf32, #tpu.memory_space<vmem>>, vector<1x64xf32>
    %4 = vector.broadcast %3 : vector<1x64xf32> to vector<128x64xf32>
    %5 = arith.addf %2, %4 : vector<128x64xf32>
    %6 = math.tanh %5 : vector<128x64xf32>
    %7 = arith.truncf %6 : vector<128x64xf32> to vector<128x64xbf16>
    %c0_5 = arith.constant 0 : index
    %c0_6 = arith.constant 0 : index
    %8 = vector.load %arg4[%c0_5, %c0_6] : memref<64x128xbf16, #tpu.memory_space<vmem>>, vector<64x128xbf16>
    %cst_7 = arith.constant dense<0.000000e+00> : vector<128x128xf32>
    %9 = tpu.matmul %7, %8, %cst_7 {dimension_numbers = #tpu.dot_dimension_numbers<[1], [0], [0], [1], [0, 0, 1, 1], [], []>} : vector<128x64xbf16>, vector<64x128xbf16>, vector<128x128xf32> -> vector<128x128xf32>
    %c0_8 = arith.constant 0 : index
    %c0_9 = arith.constant 0 : index
    %10 = vector.load %arg5[%c0_8, %c0_9] : memref<1x128xf32, #tpu.memory_space<vmem>>, vector<1x128xf32>
    %11 = vector.broadcast %10 : vector<1x128xf32> to vector<128x128xf32>
    %12 = arith.addf %9, %11 : vector<128x128xf32>
    %13 = math.tanh %12 : vector<128x128xf32>
    %14 = arith.truncf %13 : vector<128x128xf32> to vector<128x128xbf16>
    %c0_10 = arith.constant 0 : index
    %c0_11 = arith.constant 0 : index
    %15 = vector.load %arg6[%c0_10, %c0_11] : memref<128x128xbf16, #tpu.memory_space<vmem>>, vector<128x128xbf16>
    tpu.vector_store %arg6[%c0_10, %c0_11], %14 {strides = array<i32>} : memref<128x128xbf16, #tpu.memory_space<vmem>>, vector<128x128xbf16>,
    return
  }
  func.func @transform_0(%arg0: i32) -> (i32, i32) {
    %c0_i32 = arith.constant 0 : i32
    %c0_i32_0 = arith.constant 0 : i32
    return %arg0, %c0_i32 : i32, i32
  }
  func.func @transform_1(%arg0: i32) -> (i32, i32) {
    %c0_i32 = arith.constant 0 : i32
    %c0_i32_0 = arith.constant 0 : i32
    %c0_i32_1 = arith.constant 0 : i32
    return %c0_i32, %c0_i32_0 : i32, i32
  }
  func.func @transform_2(%arg0: i32) -> (i32, i32) {
    %c0_i32 = arith.constant 0 : i32
    %c0_i32_0 = arith.constant 0 : i32
    %c0_i32_1 = arith.constant 0 : i32
    return %c0_i32, %c0_i32_0 : i32, i32
  }
  func.func @transform_3(%arg0: i32) -> (i32, i32) {
    %c0_i32 = arith.constant 0 : i32
    %c0_i32_0 = arith.constant 0 : i32
    %c0_i32_1 = arith.constant 0 : i32
    return %c0_i32, %c0_i32_0 : i32, i32
  }
  func.func @transform_4(%arg0: i32) -> (i32, i32) {
    %c0_i32 = arith.constant 0 : i32
    %c0_i32_0 = arith.constant 0 : i32
    %c0_i32_1 = arith.constant 0 : i32
    return %c0_i32, %c0_i32_0 : i32, i32
  }
  func.func @transform_5(%arg0: i32) -> (i32, i32) {
    %c0_i32 = arith.constant 0 : i32
    %c0_i32_0 = arith.constant 0 : i32
    return %arg0, %c0_i32 : i32, i32
  }
}

</mosaic_0001>

<bundles_post_ra>
// kernel: tpu_custom_call.1
= control target key start
LH: loop header
LB: loop body
LE: loop exit
PB: predicated region body
PF: predicated region fallthrough
CT: control target
= control target key end

     0   :  { %s963_s0 = inlined_call_operand.vmem [shape: bf16[128,128], index: 0, kind: input, shape index: {}]   ;;  %s964_s1 = inlined_call_operand.vmem [shape: bf16[128,64], index: 1, kind: input, shape index: {}]   ;;  %s965_s2 = inlined_call_operand.vmem [shape: f32[1,64], index: 2, kind: input, shape index: {}]   ;;  %s966_s3 = inlined_call_operand.vmem [shape: bf16[64,128], index: 3, kind: input, shape index: {}]   ;;  %s967_s4 = inlined_call_operand.vmem [shape: f32[1,128], index: 4, kind: input, shape index: {}]   ;;  %s968_s5 = inlined_call_operand.hbm [shape: bf16[128,128], index: 5, kind: output, shape index: {}]  }
   0x1   :  { %v747_v0 = vld [vmem:[%s964_s1 + $0x38] sm:$0xff]   ;;  %v748_v1 = vld [vmem:[%s964_s1 + $0x30] sm:$0xff]   ;;  %v749_v2 = vld [vmem:[%s964_s1 + $0x28] sm:$0xff]  }
   0x2   :  { %688 = vmatprep.subr.bf16.mxu0 %v747_v0  ;;  %v750_v3 = vld [vmem:[%s964_s1 + $0x20] sm:$0xff]   ;;  %v751_v5 = vld [vmem:[%s964_s1 + $0x18] sm:$0xff]   ;;  %v752_v6 = vld [vmem:[%s964_s1 + $0x10] sm:$0xff]  }
   0x3   :  { %689 = vmatpush3.bf16.msra.mxu0 %v747_v0  ;;  %v755_v4 = vld [vmem:[%s963_s0] sm:$0xff]  }
   0x4   :  { %690 = vmatprep.subr.bf16.mxu0 %v748_v1  ;;  %704 = vmatprep.mubr.bf16.mxu0 %v755_v4 }
   0x7   :  { %691 = vmatpush3.bf16.msra.mxu0 %v748_v1 }
   0x8   :  { %692 = vmatprep.subr.bf16.mxu0 %v749_v2 }
   0xb   :  { %693 = vmatpush3.bf16.msra.mxu0 %v749_v2 }
   0xc   :  { %694 = vmatprep.subr.bf16.mxu0 %v750_v3 }
   0xf   :  { %695 = vmatpush3.bf16.msra.mxu0 %v750_v3 }
  0x10   :  { %696 = vmatprep.subr.bf16.mxu0 %v751_v5 }
  0x11   :  { %10 = vsyncpa [#allocation3], 0  ;;  %v753_v7 = vld [vmem:[%s964_s1 + $0x8] sm:$0xff]   ;;  %v754_v8 = vld [vmem:[%s964_s1] sm:$0xff]   ;;  %vm317_vm0 = vcmask 523264  }
  0x12   :  { %v756_v9 = vld [vmem:[%s963_s0 + $0x8] sm:$0xff]   ;;  %v757_v10 = vld [vmem:[%s963_s0 + $0x10] sm:$0xff]   ;;  %v758_v11 = vld [vmem:[%s963_s0 + $0x18] sm:$0xff]  }
  0x13   :  { %697 = vmatpush3.bf16.msra.mxu0 %v751_v5  ;;  %v759_v12 = vld [vmem:[%s963_s0 + $0x20] sm:$0xff]   ;;  %v760_v13 = vld [vmem:[%s963_s0 + $0x28] sm:$0xff]   ;;  %v761_v14 = vld [vmem:[%s963_s0 + $0x30] sm:$0xff]  }
  0x14   :  { %698 = vmatprep.subr.bf16.mxu0 %v752_v6  ;;  %v762_v15 = vld [vmem:[%s963_s0 + $0x38] sm:$0xff]   ;;  %v764_v17 = vld [vmem:[%s966_s3 + $0x10] sm:$0xff]   ;;  %v765_v18 = vld [vmem:[%s966_s3 + $0x8] sm:$0xff]  }
  0x15   :  { %v763_v16 = vld [vmem:[%s966_s3 + $0x18] sm:$0xff]   ;;  %v766_v19 = vld [vmem:[%s966_s3] sm:$0xff]  }
  0x16   :  { %720 = vmatprep.subr.bf16.mxu1 %v763_v16  ;;  %v551_v21 = vld [vmem:[%s965_s2] ss:$0 sm:$0xff] }
  0x17   :  { %699 = vmatpush3.bf16.msra.mxu0 %v752_v6  ;;  %721 = vmatpush3.bf16.msra.mxu1 %v763_v16 }
  0x18   :  { %700 = vmatprep.subr.bf16.mxu0 %v753_v7  ;;  %722 = vmatprep.subr.bf16.mxu1 %v764_v17 }
  0x1b   :  { %701 = vmatpush3.bf16.msra.mxu0 %v753_v7  ;;  %723 = vmatpush3.bf16.msra.mxu1 %v764_v17 }
  0x1c   :  { %702 = vmatprep.subr.bf16.mxu0 %v754_v8  ;;  %724 = vmatprep.subr.bf16.mxu1 %v765_v18 }
  0x1f   :  { %703 = vmatpush3.bf16.msra.mxu0 %v754_v8  ;;  %725 = vmatpush3.bf16.msra.mxu1 %v765_v18 }
  0x20   :  { %726 = vmatprep.subr.bf16.mxu1 %v766_v19 }
  0x22   :  { %705 = vmatmul.mubr.bf16.vlgmr.msra.gmra.mxu0 %v756_v9 }
  0x23   :  { %708 = vmatprep.mubr.bf16.mxu0 %v757_v10  ;;  %727 = vmatpush3.bf16.msra.mxu1 %v766_v19 }
  0x2a   :  { %709 = vmatmul.mubr.bf16.gmra.mxu0 %v758_v11 }
  0x2b   :  { %712 = vmatprep.mubr.bf16.mxu0 %v759_v12 }
  0x32   :  { %713 = vmatmul.mubr.bf16.gmra.mxu0 %v760_v13  ;;  %v568_v13 = vld [vmem:[%s967_s4] ss:$0 sm:$0xff]  ;;  %s853_s4 = smov [#allocation2]  }
  0x33   :  { %716 = vmatprep.mubr.bf16.mxu0 %v761_v14  ;;  %s540_s8 = sshll.u32 %s853_s4, 4  ;;  %s541_s8 = int_to_ptr.vmem [resolvable:$true] %s540_s8 }
  0x34   :  { %s831_s9 = scalar_lea.vmem %s541_s8, 1024  ;;  %p836_p1 = scmp.lt.s32.totalorder %s541_s8, %s541_s8 }
  0x35   :  { %p832_p0 = scmp.ne.s32.totalorder %s541_s8, %s831_s9  ;;  %p837_p2 = scmp.lt.s32.totalorder %s831_s9, %s831_s9 }
  0x37   :  { %p838_p3 = por %p837_p2, %p836_p1 }
  0x39   :  { %p839_p4 = pnand %p838_p3, %p832_p0 }
  0x3a   :  { %717 = vmatmul.mubr.bf16.gmra.mxu0 %v762_v15 }
  0xe2   :  { %v706_v20 = vpop.f32.mrf.mxu0 }
  0xe3   :  { %v200_v26 = vadd.f32 %v706_v20, %v551_v21 }
  0xe4   :  { %v191_v22 = vpop.f32.mrf.mxu0 }
  0xe5   :  { %v192_v23 = vadd.f32 %v551_v21, %v191_v22 }
  0xe6   :  { %v707_v24 = vpop.f32.mrf.mxu0 }
  0xe7   :  { %v203_v25 = vadd.f32 %v707_v24, %v551_v21  ;;  %767 = vtanh.f32 %v192_v23 }
  0xe8   :  { %v194_v27 = vpop.f32.mrf.mxu0 }
  0xe9   :  { %v195_v28 = vadd.f32 %v551_v21, %v194_v27  ;;  %769 = vtanh.f32 %v203_v25 }
  0xea   :  { %v710_v29 = vpop.f32.mrf.mxu0 }
  0xeb   :  { %771 = vtanh.f32 %v195_v28  ;;  %v216_v34 = vadd.f32 %v710_v29, %v551_v21 }
  0xec   :  { %773 = vtanh.f32 %v200_v26  ;;  %v207_v30 = vpop.f32.mrf.mxu0 }
  0xed   :  { %v208_v31 = vadd.f32 %v551_v21, %v207_v30 }
  0xee   :  { %v711_v32 = vpop.f32.mrf.mxu0 }
  0xef   :  { %v219_v33 = vadd.f32 %v711_v32, %v551_v21  ;;  %775 = vtanh.f32 %v208_v31 }
  0xf0   :  { %v210_v35 = vpop.f32.mrf.mxu0 }
  0xf1   :  { %v211_v36 = vadd.f32 %v551_v21, %v210_v35  ;;  %777 = vtanh.f32 %v219_v33 }
  0xf2   :  { %v714_v37 = vpop.f32.mrf.mxu0 }
  0xf3   :  { %779 = vtanh.f32 %v211_v36  ;;  %v232_v45 = vadd.f32 %v714_v37, %v551_v21 }
  0xf4   :  { %781 = vtanh.f32 %v216_v34  ;;  %v223_v38 = vpop.f32.mrf.mxu0  ;;  %v768_v40 = vpop.eup %767 }
  0xf5   :  { %v224_v39 = vadd.f32 %v551_v21, %v223_v38 }
  0xf6   :  { %v715_v41 = vpop.f32.mrf.mxu0  ;;  %v770_v42 = vpop.eup %769 }
  0xf7   :  { %v235_v43 = vadd.f32 %v715_v41, %v551_v21  ;;  %783 = vtanh.f32 %v224_v39 }
  0xf8   :  { %v772_v44 = vpop.eup %771  ;;  %v226_v46 = vpop.f32.mrf.mxu0 }
  0xf9   :  { %v774_v47 = vpop.eup %773  ;;  %v227_v48 = vadd.f32 %v551_v21, %v226_v46  ;;  %v270_v49 = vpack.c.bf16 %v772_v44, %v768_v40  ;;  %785 = vtanh.f32 %v235_v43 }
  0xfa   :  { %v718_v50 = vpop.f32.mrf.mxu0  ;;  %v271_v51 = vpack.c.bf16 %v770_v42, %v774_v47 }
  0xfb   :  { %787 = vtanh.f32 %v227_v48  ;;  %728 = vmatprep.mubr.msk.bf16.mxu1 %vm317_vm0, %v270_v49  ;;  %v248_v59 = vadd.f32 %v718_v50, %v551_v21 }
  0xfc   :  { %789 = vtanh.f32 %v232_v45  ;;  %v239_v52 = vpop.f32.mrf.mxu0  ;;  %729 = vmatmul.mubr.msk.bf16.vlgmr.msra.gmra.mxu1 %vm317_vm0, %v271_v51  ;;  %v776_v54 = vpop.eup %775 }
  0xfd   :  { %v240_v53 = vadd.f32 %v551_v21, %v239_v52 }
  0xfe   :  { %v719_v55 = vpop.f32.mrf.mxu0  ;;  %v778_v56 = vpop.eup %777 }
  0xff   :  { %v251_v57 = vadd.f32 %v719_v55, %v551_v21  ;;  %791 = vtanh.f32 %v240_v53 }
 0x100   :  { %v780_v58 = vpop.eup %779  ;;  %v242_v60 = vpop.f32.mrf.mxu0 }
 0x101   :  { %v782_v61 = vpop.eup %781  ;;  %v243_v62 = vadd.f32 %v551_v21, %v242_v60  ;;  %v272_v63 = vpack.c.bf16 %v780_v58, %v776_v54  ;;  %793 = vtanh.f32 %v251_v57 }
 0x102   :  { %v273_v0 = vpack.c.bf16 %v778_v56, %v782_v61 }
 0x103   :  { %795 = vtanh.f32 %v243_v62  ;;  %732 = vmatprep.mubr.msk.bf16.mxu1 %vm317_vm0, %v272_v63 }
 0x104   :  { %797 = vtanh.f32 %v248_v59  ;;  %733 = vmatmul.mubr.msk.bf16.gmra.mxu1 %vm317_vm0, %v273_v0  ;;  %v784_v1 = vpop.eup %783 }
 0x106   :  { %v786_v2 = vpop.eup %785 }
 0x108   :  { %v788_v3 = vpop.eup %787 }
 0x109   :  { %v790_v4 = vpop.eup %789  ;;  %v274_v5 = vpack.c.bf16 %v788_v3, %v784_v1 }
 0x10a   :  { %v275_v6 = vpack.c.bf16 %v786_v2, %v790_v4 }
 0x10b   :  { %736 = vmatprep.mubr.msk.bf16.mxu1 %vm317_vm0, %v274_v5 }
 0x10c   :  { %737 = vmatmul.mubr.msk.bf16.gmra.mxu1 %vm317_vm0, %v275_v6  ;;  %v792_v7 = vpop.eup %791 }
 0x10e   :  { %v794_v8 = vpop.eup %793 }
 0x110   :  { %v796_v9 = vpop.eup %795 }
 0x111   :  { %v798_v10 = vpop.eup %797  ;;  %v276_v11 = vpack.c.bf16 %v796_v9, %v792_v7 }
 0x112   :  { %v277_v12 = vpack.c.bf16 %v794_v8, %v798_v10 }
 0x113   :  { %740 = vmatprep.mubr.msk.bf16.mxu1 %vm317_vm0, %v276_v11 }
 0x114   :  { %741 = vmatmul.mubr.msk.bf16.gmra.mxu1 %vm317_vm0, %v277_v12 }
 0x1bc   :  { %v730_v14 = vpop.f32.mrf.mxu1 }
 0x1bd   :  { %v385_v15 = vadd.f32 %v730_v14, %v568_v13 }
 0x1be   :  { %v376_v16 = vpop.f32.mrf.mxu1 }
 0x1bf   :  { %v377_v17 = vadd.f32 %v568_v13, %v376_v16  ;;  %799 = vtanh.f32 %v385_v15 }
 0x1c0   :  { %v731_v18 = vpop.f32.mrf.mxu1 }
 0x1c1   :  { %v388_v19 = vadd.f32 %v731_v18, %v568_v13 }
 0x1c2   :  { %v379_v20 = vpop.f32.mrf.mxu1 }
 0x1c3   :  { %801 = vtanh.f32 %v388_v19  ;;  %v380_v21 = vadd.f32 %v568_v13, %v379_v20 }
 0x1c4   :  { %803 = vtanh.f32 %v377_v17  ;;  %v734_v22 = vpop.f32.mrf.mxu1 }
 0x1c5   :  { %805 = vtanh.f32 %v380_v21  ;;  %v401_v23 = vadd.f32 %v734_v22, %v568_v13 }
 0x1c6   :  { %v392_v24 = vpop.f32.mrf.mxu1 }
 0x1c7   :  { %v393_v25 = vadd.f32 %v568_v13, %v392_v24  ;;  %807 = vtanh.f32 %v401_v23 }
 0x1c8   :  { %v735_v26 = vpop.f32.mrf.mxu1 }
 0x1c9   :  { %v404_v27 = vadd.f32 %v735_v26, %v568_v13 }
 0x1ca   :  { %v395_v28 = vpop.f32.mrf.mxu1 }
 0x1cb   :  { %809 = vtanh.f32 %v404_v27  ;;  %v396_v29 = vadd.f32 %v568_v13, %v395_v28 }
 0x1cc   :  { %811 = vtanh.f32 %v393_v25  ;;  %v738_v30 = vpop.f32.mrf.mxu1  ;;  %v800_v33 = vpop.eup %799 }
 0x1cd   :  { %813 = vtanh.f32 %v396_v29  ;;  %v417_v31 = vadd.f32 %v738_v30, %v568_v13 }
 0x1ce   :  { %v408_v32 = vpop.f32.mrf.mxu1 }
 0x1cf   :  { %v409_v35 = vadd.f32 %v568_v13, %v408_v32  ;;  %815 = vtanh.f32 %v417_v31 }
 0x1d0   :  { %v802_v34 = vpop.eup %801  ;;  %v739_v36 = vpop.f32.mrf.mxu1 }
 0x1d1   :  { %v804_v37 = vpop.eup %803  ;;  %v621_v38 = vpack.c.bf16 %v802_v34, %v800_v33  ;;  %v420_v39 = vadd.f32 %v739_v36, %v568_v13 }
 0x1d2   :  { %v806_v40 = vpop.eup %805  ;;  %v411_v41 = vpop.f32.mrf.mxu1 }
 0x1d3   :  { %653 = vst [vmem:[#allocation2 + $0x8] sm:$0xff] %v621_v38   ;;  %v616_v42 = vpack.c.bf16 %v806_v40, %v804_v37  ;;  %817 = vtanh.f32 %v420_v39  ;;  %v412_v43 = vadd.f32 %v568_v13, %v411_v41 }
 0x1d4   :  { %819 = vtanh.f32 %v409_v35  ;;  %v742_v44 = vpop.f32.mrf.mxu1  ;;  %v808_v47 = vpop.eup %807 }
 0x1d5   :  { %617 = vst [vmem:[#allocation2] sm:$0xff] %v616_v42   ;;  %821 = vtanh.f32 %v412_v43  ;;  %v433_v45 = vadd.f32 %v742_v44, %v568_v13 }
 0x1d6   :  { %v424_v46 = vpop.f32.mrf.mxu1 }
 0x1d7   :  { %v425_v49 = vadd.f32 %v568_v13, %v424_v46  ;;  %823 = vtanh.f32 %v433_v45 }
 0x1d8   :  { %v810_v48 = vpop.eup %809  ;;  %v743_v50 = vpop.f32.mrf.mxu1 }
 0x1d9   :  { %v812_v51 = vpop.eup %811  ;;  %v631_v52 = vpack.c.bf16 %v810_v48, %v808_v47  ;;  %v436_v53 = vadd.f32 %v743_v50, %v568_v13 }
 0x1da   :  { %v814_v54 = vpop.eup %813  ;;  %v427_v55 = vpop.f32.mrf.mxu1 }
 0x1db   :  { %655 = vst [vmem:[#allocation2 + $0x18] sm:$0xff] %v631_v52   ;;  %v626_v56 = vpack.c.bf16 %v814_v54, %v812_v51  ;;  %825 = vtanh.f32 %v436_v53  ;;  %v428_v57 = vadd.f32 %v568_v13, %v427_v55 }
 0x1dc   :  { %827 = vtanh.f32 %v425_v49  ;;  %v816_v58 = vpop.eup %815 }
 0x1dd   :  { %654 = vst [vmem:[#allocation2 + $0x10] sm:$0xff] %v626_v56   ;;  %829 = vtanh.f32 %v428_v57 }
 0x1e0   :  { %v818_v59 = vpop.eup %817 }
 0x1e1   :  { %v820_v60 = vpop.eup %819  ;;  %v641_v61 = vpack.c.bf16 %v818_v59, %v816_v58 }
 0x1e2   :  { %v822_v62 = vpop.eup %821 }
 0x1e3   :  { %657 = vst [vmem:[#allocation2 + $0x28] sm:$0xff] %v641_v61   ;;  %v636_v63 = vpack.c.bf16 %v822_v62, %v820_v60 }
 0x1e4   :  { %v824_v0 = vpop.eup %823 }
 0x1e5   :  { %656 = vst [vmem:[#allocation2 + $0x20] sm:$0xff] %v636_v63  }
 0x1e8   :  { %v826_v1 = vpop.eup %825 }
 0x1e9   :  { %v828_v2 = vpop.eup %827  ;;  %v651_v3 = vpack.c.bf16 %v826_v1, %v824_v0 }
 0x1ea   :  { %v830_v4 = vpop.eup %829 }
 0x1eb   :  { %659 = vst [vmem:[#allocation2 + $0x38] sm:$0xff] %v651_v3   ;;  %v646_v5 = vpack.c.bf16 %v830_v4, %v828_v2 }
 0x1ed   :  { %658 = vst [vmem:[#allocation2 + $0x30] sm:$0xff] %v646_v5  }
 0x1ee   :  { %842 = shalt.err (!%p839_p4)
}
 0x1ef   :  { %s854_s10 = smov 64   ;;  %s855_s11 = smov 4  }
 0x1f0   :  { %546 = dma.vmem_to_hbm [thread:$0]  %s541_s8, 1024, %s968_s5, [#allocation3], %s854_s10, %s854_s10, %s855_s11  }
 0x1f1   :  { %851 = dma.done.wait [#allocation3], 1024  }
 0x1f2   :  { %852 = vsyncadd [#allocation3], 4294966272 }
 0x1f3   :  { %550 = vsyncpa [#allocation3], 1 }

</bundles_post_ra>
